<compile_context>
chip_gen: v6e
topology: v6e:2x2x1
jax: 0.10.0
libtpu: 0.0.40
codegen_flags: <defaults>
</compile_context>

<pallas_src>
import numpy as np
import jax
import jax.numpy as jnp
from jax.experimental import pallas as pl
from jax.experimental.pallas import tpu as pltpu


def _gaussian_taps_1d(sigma: float = 1.0, truncate: float = 4.0) -> np.ndarray:
    """1-D taps v such that scipy.ndimage.gaussian_filter(delta_3x3, sigma)
    == outer(v, v).  (scipy applies a truncated 1-D gaussian separably with
    symmetric 'reflect' boundaries; the 3x3 delta input is itself separable.)
    """
    radius = int(truncate * sigma + 0.5)
    t = np.arange(-radius, radius + 1, dtype=np.float64)
    w = np.exp(-0.5 * (t / sigma) ** 2)
    w /= w.sum()

    n = 3
    sig = np.array([0.0, 1.0, 0.0], dtype=np.float64)

    def reflect_idx(p: int) -> int:           # scipy mode='reflect' (symmetric)
        period = 2 * n
        p = p % period
        return p if p < n else period - 1 - p

    v = np.zeros(n, dtype=np.float64)
    for j in range(n):
        for i in range(-radius, radius + 1):
            v[j] += w[i + radius] * sig[reflect_idx(j + i)]
    return v.astype(np.float32)


_V = _gaussian_taps_1d()
_V0, _V1, _V2 = float(_V[0]), float(_V[1]), float(_V[2])


def _make_kernel_nc_first(h: int, w: int):
    """Layout (B, H, W): W on lanes.  Used when W is large or N*C is small."""
    ho, wo = h + 2, w + 2

    def kernel(x_ref, o_ref):
        x = x_ref[...].astype(jnp.float32)                       # (b, h, w)
        # fused ReflectionPad2d(2) on rows, built in registers (single concat)
        xr = jnp.concatenate(
            [x[:, 2:3, :], x[:, 1:2, :], x,
             x[:, h - 2:h - 1, :], x[:, h - 3:h - 2, :]], axis=1)  # (b, h+4, w)
        # separable Gaussian, vertical 3-tap pass (sublane shifts)
        t = (_V0 * xr[:, 0:ho, :] + _V1 * xr[:, 1:ho + 1, :]
             + _V2 * xr[:, 2:ho + 2, :])                          # (b, ho, w)
        # reflection pad on columns, then horizontal 3-tap pass (lane shifts)
        tp = jnp.concatenate(
            [t[:, :, 2:3], t[:, :, 1:2], t,
             t[:, :, w - 2:w - 1], t[:, :, w - 3:w - 2]], axis=2)  # (b, ho, w+4)
        out = (_V0 * tp[:, :, 0:wo] + _V1 * tp[:, :, 1:wo + 1]
               + _V2 * tp[:, :, 2:wo + 2])                        # (b, ho, wo)
        o_ref[...] = out.astype(o_ref.dtype)

    return kernel


def _make_kernel_nc_last(h: int, w: int):
    """Layout (H, W, NC): flattened batch on lanes (fully lane-dense)."""
    ho, wo = h + 2, w + 2

    def kernel(x_ref, o_ref):
        x = x_ref[...].astype(jnp.float32)                        # (h, w, bnc)
        xr = jnp.concatenate(
            [x[2:3], x[1:2], x, x[h - 2:h - 1], x[h - 3:h - 2]],
            axis=0)                                               # (h+4, w, bnc)
        # vertical pass: shifts on the leading axis (free)
        t = _V0 * xr[0:ho] + _V1 * xr[1:ho + 1] + _V2 * xr[2:ho + 2]
        # horizontal pass: pad + shifts on the sublane axis (XLU)
        tp = jnp.concatenate(
            [t[:, 2:3], t[:, 1:2], t, t[:, w - 2:w - 1], t[:, w - 3:w - 2]],
            axis=1)                                               # (ho, w+4, bnc)
        out = _V0 * tp[:, 0:wo] + _V1 * tp[:, 1:wo + 1] + _V2 * tp[:, 2:wo + 2]
        o_ref[...] = out.astype(o_ref.dtype)

    return kernel


def _vmem_limit_bytes() -> int:
    """~48 MiB scoped limit on a 64 MiB part (v7x TC), ~96 MiB on 128 MiB parts."""
    try:
        cap = int(pltpu.get_tpu_info().vmem_capacity_bytes)
    except Exception:
        cap = 64 << 20          # conservative fallback (v7x per-TensorCore)
    return max(16 << 20, min(cap - (16 << 20), 96 << 20))


def _round_up(x: int, m: int) -> int:
    return -(-x // m) * m


def gaussian_layer(x: jax.Array) -> jax.Array:
    """x: (N, C, H, W) -> (N, C, H+2, W+2); fixed depthwise Gaussian filter."""
    n, c, h, w = x.shape
    assert h >= 3 and w >= 3, "ReflectionPad2d(2) requires H, W >= 3"
    nc = n * c
    ho, wo = h + 2, w + 2

    vmem_limit = _vmem_limit_bytes()
    block_budget = (vmem_limit * 3) // 4     # room for double-buffered blocks + temps
    # bytes per image (or per lane-column): 2x-buffered in & out blocks plus the
    # single-buffered in-register intermediates (row-padded input, padded t).
    per_unit = 4 * (2 * h * w + 2 * ho * wo + (h + 4) * w + ho * (w + 4))

    compiler_params = pltpu.CompilerParams(
        dimension_semantics=("parallel",),
        vmem_limit_bytes=int(vmem_limit))

    if nc >= 128 and w <= 64:
        # Lane-dense relayout: W is far below the 128-lane width, so put the
        # flattened N*C axis on lanes (blocks that are multiples of 128).
        xt = jnp.transpose(x.reshape(nc, h, w), (1, 2, 0))        # (H, W, NC)
        bnc = max(128, (block_budget // per_unit) // 128 * 128)
        bnc = min(bnc, max(128, _round_up(pl.cdiv(nc, 6), 128)))  # >= ~6 steps if possible
        bnc = min(bnc, _round_up(nc, 128))
        grid = pl.cdiv(nc, bnc)
        out = pl.pallas_call(
            _make_kernel_nc_last(h, w),
            out_shape=jax.ShapeDtypeStruct((ho, wo, nc), x.dtype),
            grid=(grid,),
            in_specs=[pl.BlockSpec((h, w, bnc), lambda i: (0, 0, i))],
            out_specs=pl.BlockSpec((ho, wo, bnc), lambda i: (0, 0, i)),
            compiler_params=compiler_params,
        )(xt)
        return jnp.transpose(out, (2, 0, 1)).reshape(n, c, ho, wo)

    # Default layout: flatten (N, C) -> batch axis (all channels share the same
    # constant filter); W stays on lanes.
    x2 = x.reshape(nc, h, w)
    b = max(1, min(nc, block_budget // per_unit))
    # keep >= ~6 grid steps when possible: 2-3 tiles per v7x TensorCore so the
    # BlockSpec double-buffer pipeline overlaps DMA with compute.
    b = min(b, pl.cdiv(nc, min(nc, 6)))
    grid = pl.cdiv(nc, b)
    out = pl.pallas_call(
        _make_kernel_nc_first(h, w),
        out_shape=jax.ShapeDtypeStruct((nc, ho, wo), x.dtype),
        grid=(grid,),
        in_specs=[pl.BlockSpec((b, h, w), lambda i: (i, 0, 0))],
        out_specs=pl.BlockSpec((b, ho, wo), lambda i: (i, 0, 0)),
        compiler_params=compiler_params,
    )(x2)
    return out.reshape(n, c, ho, wo)


def _reference(x: jax.Array) -> jax.Array:
    """Pure-JAX reference: jnp.pad 'reflect' == torch ReflectionPad2d, then the
    full (non-separable) 3x3 conv with the same fixed Gaussian taps."""
    k = jnp.asarray(np.outer(_V, _V))
    N, C, H, W = x.shape
    xp = jnp.pad(x, ((0, 0), (0, 0), (2, 2), (2, 2)), mode="reflect")
    ref = jnp.zeros((N, C, H + 2, W + 2), x.dtype)
    for i in range(3):
        for j in range(3):
            ref = ref + k[i, j] * xp[:, :, i:i + H + 2, j:j + W + 2]
    return ref


if __name__ == "__main__":
    key = jax.random.PRNGKey(0)
    k1, k2 = jax.random.split(key)

    # Primary case (module fixes channels = 3): exercises the default layout.
    N, C, H, W = 2, 3, 16, 16
    x = jax.random.normal(k1, (N, C, H, W), dtype=jnp.float32)
    y = gaussian_layer(x)
    jax.block_until_ready(y)
    assert y.shape == (N, C, H + 2, W + 2), y.shape
    assert jnp.allclose(y, _reference(x), atol=1e-5, rtol=1e-5), \
        "Pallas kernel mismatch vs reference (default layout)"

    # Larger batch: exercises the lane-dense (NC-last) path (N*C >= 128, W small).
    xb = jax.random.normal(k2, (48, 3, 16, 16), dtype=jnp.float32)
    yb = gaussian_layer(xb)
    jax.block_until_ready(yb)
    assert yb.shape == (48, 3, 18, 18), yb.shape
    assert jnp.allclose(yb, _reference(xb), atol=1e-5, rtol=1e-5), \
        "Pallas kernel mismatch vs reference (lane-dense layout)"

    print("KERNEL_OK")
</pallas_src>

<mosaic_0001>
module attributes {stable_mosaic.version = 11 : i64} {
  func.func @kernel(%arg0: i32, %arg1: memref<1x16x16xf32, #tpu.memory_space<vmem>>, %arg2: memref<1x18x18xf32, #tpu.memory_space<vmem>>) attributes {dimension_semantics = [#tpu.dimension_semantics<parallel>], iteration_bounds = array<i64: 6>, scalar_prefetch = 0 : i64, scratch_operands = 0 : i64, tpu.core_type = #tpu.core_type<tc>, window_params = [{transform_indices = @transform_0, window_bounds = array<i64: 1, 16, 16>}, {transform_indices = @transform_1, window_bounds = array<i64: 1, 18, 18>}]} {
    %c0 = arith.constant 0 : index
    %c0_0 = arith.constant 0 : index
    %c0_1 = arith.constant 0 : index
    %0 = vector.load %arg1[%c0, %c0_0, %c0_1] : memref<1x16x16xf32, #tpu.memory_space<vmem>>, vector<1x16x16xf32>
    %1 = vector.extract_strided_slice %0 {offsets = [0, 2, 0], sizes = [1, 1, 16], strides = [1, 1, 1]} : vector<1x16x16xf32> to vector<1x1x16xf32>
    %2 = vector.extract_strided_slice %0 {offsets = [0, 1, 0], sizes = [1, 1, 16], strides = [1, 1, 1]} : vector<1x16x16xf32> to vector<1x1x16xf32>
    %3 = vector.extract_strided_slice %0 {offsets = [0, 14, 0], sizes = [1, 1, 16], strides = [1, 1, 1]} : vector<1x16x16xf32> to vector<1x1x16xf32>
    %4 = vector.extract_strided_slice %0 {offsets = [0, 13, 0], sizes = [1, 1, 16], strides = [1, 1, 1]} : vector<1x16x16xf32> to vector<1x1x16xf32>
    %5 = tpu.concatenate %1, %2, %0, %3, %4 in 1 : vector<1x1x16xf32>, vector<1x1x16xf32>, vector<1x16x16xf32>, vector<1x1x16xf32>, vector<1x1x16xf32> -> vector<1x20x16xf32>
    %6 = vector.extract_strided_slice %5 {offsets = [0, 0, 0], sizes = [1, 18, 16], strides = [1, 1, 1]} : vector<1x20x16xf32> to vector<1x18x16xf32>
    %cst = arith.constant 0.296096414 : f32
    %7 = vector.broadcast %cst : f32 to vector<1x18x16xf32>
    %8 = arith.mulf %7, %6 : vector<1x18x16xf32>
    %9 = vector.extract_strided_slice %5 {offsets = [0, 1, 0], sizes = [1, 18, 16], strides = [1, 1, 1]} : vector<1x20x16xf32> to vector<1x18x16xf32>
    %cst_2 = arith.constant 0.407807201 : f32
    %10 = vector.broadcast %cst_2 : f32 to vector<1x18x16xf32>
    %11 = arith.mulf %10, %9 : vector<1x18x16xf32>
    %12 = arith.addf %8, %11 : vector<1x18x16xf32>
    %13 = vector.extract_strided_slice %5 {offsets = [0, 2, 0], sizes = [1, 18, 16], strides = [1, 1, 1]} : vector<1x20x16xf32> to vector<1x18x16xf32>
    %cst_3 = arith.constant 0.296096414 : f32
    %14 = vector.broadcast %cst_3 : f32 to vector<1x18x16xf32>
    %15 = arith.mulf %14, %13 : vector<1x18x16xf32>
    %16 = arith.addf %12, %15 : vector<1x18x16xf32>
    %17 = vector.extract_strided_slice %16 {offsets = [0, 0, 2], sizes = [1, 18, 1], strides = [1, 1, 1]} : vector<1x18x16xf32> to vector<1x18x1xf32>
    %18 = vector.extract_strided_slice %16 {offsets = [0, 0, 1], sizes = [1, 18, 1], strides = [1, 1, 1]} : vector<1x18x16xf32> to vector<1x18x1xf32>
    %19 = vector.extract_strided_slice %16 {offsets = [0, 0, 14], sizes = [1, 18, 1], strides = [1, 1, 1]} : vector<1x18x16xf32> to vector<1x18x1xf32>
    %20 = vector.extract_strided_slice %16 {offsets = [0, 0, 13], sizes = [1, 18, 1], strides = [1, 1, 1]} : vector<1x18x16xf32> to vector<1x18x1xf32>
    %21 = tpu.concatenate %17, %18, %16, %19, %20 in 2 : vector<1x18x1xf32>, vector<1x18x1xf32>, vector<1x18x16xf32>, vector<1x18x1xf32>, vector<1x18x1xf32> -> vector<1x18x20xf32>
    %22 = vector.extract_strided_slice %21 {offsets = [0, 0, 0], sizes = [1, 18, 18], strides = [1, 1, 1]} : vector<1x18x20xf32> to vector<1x18x18xf32>
    %cst_4 = arith.constant 0.296096414 : f32
    %23 = vector.broadcast %cst_4 : f32 to vector<1x18x18xf32>
    %24 = arith.mulf %23, %22 : vector<1x18x18xf32>
    %25 = vector.extract_strided_slice %21 {offsets = [0, 0, 1], sizes = [1, 18, 18], strides = [1, 1, 1]} : vector<1x18x20xf32> to vector<1x18x18xf32>
    %cst_5 = arith.constant 0.407807201 : f32
    %26 = vector.broadcast %cst_5 : f32 to vector<1x18x18xf32>
    %27 = arith.mulf %26, %25 : vector<1x18x18xf32>
    %28 = arith.addf %24, %27 : vector<1x18x18xf32>
    %29 = vector.extract_strided_slice %21 {offsets = [0, 0, 2], sizes = [1, 18, 18], strides = [1, 1, 1]} : vector<1x18x20xf32> to vector<1x18x18xf32>
    %cst_6 = arith.constant 0.296096414 : f32
    %30 = vector.broadcast %cst_6 : f32 to vector<1x18x18xf32>
    %31 = arith.mulf %30, %29 : vector<1x18x18xf32>
    %32 = arith.addf %28, %31 : vector<1x18x18xf32>
    %c0_7 = arith.constant 0 : index
    %c0_8 = arith.constant 0 : index
    %c0_9 = arith.constant 0 : index
    %33 = vector.load %arg2[%c0_7, %c0_8, %c0_9] : memref<1x18x18xf32, #tpu.memory_space<vmem>>, vector<1x18x18xf32>
    tpu.vector_store %arg2[%c0_7, %c0_8, %c0_9], %32 {strides = array<i32>} : memref<1x18x18xf32, #tpu.memory_space<vmem>>, vector<1x18x18xf32>,
    return
  }
  func.func @transform_0(%arg0: i32) -> (i32, i32, i32) {
    %c0_i32 = arith.constant 0 : i32
    %c0_i32_0 = arith.constant 0 : i32
    %c0_i32_1 = arith.constant 0 : i32
    return %arg0, %c0_i32, %c0_i32_0 : i32, i32, i32
  }
  func.func @transform_1(%arg0: i32) -> (i32, i32, i32) {
    %c0_i32 = arith.constant 0 : i32
    %c0_i32_0 = arith.constant 0 : i32
    %c0_i32_1 = arith.constant 0 : i32
    return %arg0, %c0_i32, %c0_i32_0 : i32, i32, i32
  }
}

</mosaic_0001>

<bundles_post_ra>
// kernel: tpu_custom_call.1
= control target key start
LH: loop header
LB: loop body
LE: loop exit
PB: predicated region body
PF: predicated region fallthrough
CT: control target
= control target key end

     0   :  { %6 = vsyncpa [#allocation3], 0  ;;  %s728_s0 = inlined_call_operand.hbm [shape: f32[6,16,16], index: 0, kind: input, shape index: {}]   ;;  %s729_s1 = inlined_call_operand.hbm [shape: f32[6,18,18], index: 1, kind: output, shape index: {}]  }
   0x1   :  { %8 = vsyncpa [#allocation3 + $0x1], 0 }
   0x2   :  { %9 = vsyncpa [#allocation4], 0 }
   0x3   :  { %11 = vsyncpa [#allocation4 + $0x1], 0  ;;  %s560_s6 = smov 0   ;;  %s562_s7 = smov 0  }
   0x4   :  { %s564_s8 = smov 0   ;;  %s566_s9 = smov 0  }
   0x5 LB: > { %s581_s10 = sadd.s32 4294967295, %s537_s9   ;;  %s376_s11 = sadd.s32 4294967294, %s537_s9   ;;  %s537_s9 = sphi %s566_s9, %s743_s9   ;;  %s533_s8 = sphi %s564_s8, %s742_s8   ;;  %s529_s7 = sphi %s562_s7, %s741_s7   ;;  %s525_s6 = sphi %s560_s6, %s740_s6  }
   0x6   : > { %s585_s12 = sadd.s32 1, %s537_s9   ;;  %s24_s13 = sadd.s32 1, %s533_s8 }
   0x7   : > { %s21_s14 = ssub.s32 %s537_s9, %s585_s12  ;;  %p31_p0 = scmp.ne.s32.totalorder %s533_s8, %s529_s7 }
   0x8   : > { %p22_p1 = scmp.eq.s32.totalorder %s21_s14, 0  ;;  %p32_p2 = scmp.eq.s32.totalorder %s537_s9, 0 }
   0x9   : > { %p37_p3 = scmp.ne.s32.totalorder %s529_s7, %s525_s6  ;;  %p38_p4 = scmp.eq.s32.totalorder %s581_s10, 0 }
   0xa   : > { %s597_s15 = scalar_select %p22_p1, %s533_s8, %s24_s13  }
   0xb   : > { %p599_p5 = por %p32_p2, %p31_p0  ;;  %p603_p6 = por %p38_p4, %p37_p3 }
   0xc   : > { %p61_p7 = scmp.eq.s32.totalorder %s581_s10, 5  ;;  %p67_p8 = scmp.eq.s32.totalorder %s376_s11, 5 }
   0xd   : > { %s733_s17 = scalar_select %p603_p6, 1, 0 }
   0xe   : > { %p402_p9 = scmp.lt.s32.totalorder %s537_s9, 6  ;;  %p609_p10 = por %p61_p7, %p31_p0 }
   0xf   : > { %p613_p11 = por %p67_p8, %p37_p3  ;;  %s87_s20 = sand.u32 1, %s533_s8  }
  0x10   : > { %s734_s18 = scalar_select %p609_p10, 1, 0 }
  0x11   : > { %s735_s19 = scalar_select %p613_p11, 1, 0 }
  0x12   : > { %s387_s21 = sshll.u32 %s537_s9, 8  ;;  %s379_s22 = sshll.u32 %s87_s20, 4 }
  0x13   : > { %s622_s25 = scalar_lea.hbm %s728_s0, %s387_s21  ;;  %s91_s26 = scalar_lea.vmem [#allocation2], %s379_s22 }
  0x14   : > { %s98_s27 = sshll.u32 %s91_s26, 4  ;;  %p626_p12 = pnand %p402_p9, %p599_p5  ;;  %s630_s27 = int_to_ptr.vmem [resolvable:$true] %s98_s27 }
  0x15   : > { %s632_s29 = scalar_lea.sflag [#allocation3], %s87_s20  ;;  %s445_s30 = scalar_lea.hbm %s622_s25, 256 }
  0x16   : > { %p446_p13 = scmp.ne.s32.totalorder %s622_s25, %s445_s30  ;;  %p447_p0 = pneg %p626_p12 }
  0x17   : > { %s450_s4 = scalar_lea.hbm %s728_s0, 1536  ;;  %p451_p3 = scmp.lt.s32.totalorder %s622_s25, %s728_s0 }
  0x18   : > { %p448_p1 = pnand %p447_p0, %p446_p13  ;;  %p452_p4 = scmp.lt.s32.totalorder %s450_s4, %s445_s30 }
  0x1a   : > { %p449_p2 = pneg %p448_p1  ;;  %p453_p5 = por %p452_p4, %p451_p3 }
  0x1c   : > { %p454_p7 = pnand %p453_p5, %p449_p2 }
  0x1e   : > { %457 = shalt.err (!%p454_p7)
}
  0x1f   : > { %s458_s13 = scalar_lea.vmem %s630_s27, 256  ;;  %s539_s14 = smov [#allocation2]  }
  0x20   : > { %p459_p8 = scmp.ne.s32.totalorder %s630_s27, %s458_s13  ;;  %s463_s16 = sshll.u32 %s539_s14, 4  ;;  %s464_s16 = int_to_ptr.vmem [resolvable:$false] %s463_s16 }
  0x21   : > { %s465_s20 = scalar_lea.vmem %s464_s16, 512  ;;  %p466_p1 = scmp.lt.s32.totalorder %s630_s27, %s464_s16 }
  0x22   : > { %p461_p9 = pnand %p459_p8, %p447_p0  ;;  %p467_p11 = scmp.lt.s32.totalorder %s465_s20, %s458_s13 }
  0x24   : > { %p462_p13 = pneg %p461_p9  ;;  %p468_p10 = por %p467_p11, %p466_p1 }
  0x26   : > { %p469_p6 = pnand %p468_p10, %p462_p13 }
  0x28   : > { %472 = shalt.err (!%p469_p6)
}
  0x29   : > { %s540_s21 = smov 128   ;;  %s541_s22 = smov 8  }
  0x2a   : > { %397 = dma.hbm_to_vmem [thread:$0]  (!%p626_p12), %s622_s25, 256, %s630_s27, %s632_s29, %s540_s21, %s540_s21, %s541_s22  }
  0x2b   : > { %p382_p0 = scmp.ge.s32.totalorder %s537_s9, 1  ;;  %p106_p2 = scmp.lt.s32.totalorder %s537_s9, 7 }
  0x2d   : > { %p107_p3 = pnand %p382_p0, %p106_p2 }
  0x2e   : > { %s656_s23 = sand.u32 (!%p107_p3), 1, %s529_s7   ;;  %p737_p6 = scmp.ne.s32.totalorder (!%p107_p3), %s733_s17, 0 }
  0x2f   : > { %110 = sbr.rel (%p107_p3) target bundleno = 344 (0x158), region = 24  ;;  %s383_s24 = sshll.u32 (!%p107_p3), %s656_s23, 4 }
  0x30   : > { %s113_s26 = scalar_lea.sflag (!%p107_p3), [#allocation3], %s656_s23  ;;  %s116_s30 = scalar_lea.vmem (!%p107_p3), [#allocation2], %s383_s24 }
  0x34   : > { %516 = dma.done.wait (%p737_p6), %s113_s26, 256  }
  0x35   : > { %518 = vsyncadd (%p737_p6), %s113_s26, 4294967040  ;;  %v136_v0 = vld [vmem:[%s116_s30 + $0x8] sm:$0xff]  ;;  %vm141_vm0 = vcmask 1041408   ;;  %vm156_vm1 = vcmask 1042432   ;;  %v135_v1 = vld [vmem:[%s116_s30] sm:$0xff]  ;;  %vm152_vm2 = vcmask 1040384  }
  0x36   : > { %v143_v2 = vrot.slane %v136_v0, 6  ;;  %v148_v3 = vrot.slane %v136_v0, 4  ;;  %v150_v4 = vrot.slane %v136_v0, 2  ;;  %v138_v5 = vrot.slane %v135_v1, 2  ;;  %s542_s17 = smov 4   ;;  %s543_s25 = smov 126  }
  0x37   : > { %v142_v6 = vrot.slane %v135_v1, 6  ;;  %vm167_vm3 = vcmask 1046528   ;;  %vm182_vm4 = vcmask 1045504   ;;  %s544_s27 = smov 2   ;;  %s545_s28 = smov 6   ;;  %vm233_vm5 = vcmask 7168  }
  0x38   : > { %v155_v7 = vsel %vm141_vm0, %v143_v2, %v148_v3  ;;  %v153_v8 = vsel %vm152_vm2, %v138_v5, %v135_v1  ;;  %vm237_vm6 = vcmask 15360   ;;  %vm241_vm7 = vcmask 146432   ;;  %s546_s29 = smov 127   ;;  %s388_s2 = smul.u32 24, %s656_s23 }
  0x39   : > { %v157_v9 = vsel %vm156_vm1, %v155_v7, %v150_v4  ;;  %v144_v10 = vsel %vm141_vm0, %v142_v6, %v143_v2  ;;  %v154_v11 = vsel %vm141_vm0, %v153_v8, %v142_v6  ;;  %vm245_vm8 = vcmask 154624   ;;  %s389_s5 = smul.u32 384, %s581_s10  ;;  %s290_s10 = scalar_lea.sflag [#allocation4], %s656_s23 }
  0x3a   : > { %v160_v12 = vmul.f32 0.2960964, %v157_v9  ;;  %v163_v13 = vmul.f32 0.4078072, %v157_v9  ;;  %v158_v14 = vmul.f32 0.2960964, %v154_v11 }
  0x3b   : > { %v159_v15 = vmul.f32 0.2960964, %v144_v10  ;;  %v161_v16 = vmul.f32 0.4078072, %v154_v11  ;;  %v162_v17 = vmul.f32 0.4078072, %v144_v10  ;;  %s685_s14 = scalar_lea.hbm %s729_s1, %s389_s5 }
  0x3c   : > { %v171_v18 = vrot.slane %v163_v13, 1  ;;  %v186_v19 = vrot.slane %v160_v12, 2  ;;  %v183_v20 = vrot.slane %v158_v14, 2  ;;  %s134_s3 = scalar_lea.vmem [#allocation5], %s388_s2  ;;  %vm287_vm9 = vcmask 140288   ;;  %p738_p11 = scmp.ne.s32.totalorder %s734_s18, 0 }
  0x3d   : > { %v168_v21 = vrot.slane %v161_v16, 1  ;;  %v169_v22 = vrot.slane %v162_v17, 1  ;;  %v184_v23 = vrot.slane %v159_v15, 2  ;;  %s303_s4 = sshll.u32 %s134_s3, 4  ;;  %s547_s20 = smov [#allocation5]   ;;  %s679_s4 = int_to_ptr.vmem [resolvable:$true] %s303_s4 }
  0x3e   : > { %v178_v24 = vadd.f32 %v171_v18, %v160_v12  ;;  %s473_s16 = scalar_lea.vmem %s679_s4, 384  ;;  %s477_s21 = sshll.u32 %s547_s20, 4  ;;  %s478_s21 = int_to_ptr.vmem [resolvable:$false] %s477_s21 }
  0x3f   : > { %v170_v25 = vsel %vm167_vm3, %v168_v21, %v169_v22  ;;  %v185_v26 = vsel %vm182_vm4, %v183_v20, %v184_v23  ;;  %v172_v27 = vsel %vm167_vm3, %v169_v22, %v171_v18  ;;  %v187_v32 = vsel %vm182_vm4, %v184_v23, %v186_v19  ;;  %p474_p10 = scmp.ne.s32.totalorder %s679_s4, %s473_s16  ;;  %s479_s22 = scalar_lea.vmem %s478_s21, 768 }
  0x40   : > { %v193_v28 = vadd.f32 %v186_v19, %v178_v24  ;;  %v176_v29 = vadd.f32 %v170_v25, %v158_v14  ;;  %v177_v31 = vadd.f32 %v172_v27, %v159_v15  ;;  %p480_p5 = scmp.lt.s32.totalorder %s679_s4, %s478_s21  ;;  %p481_p7 = scmp.lt.s32.totalorder %s479_s22, %s473_s16 }
  0x41   : > { %p475_p12 = pnand %p474_p10, %p738_p11 }
  0x42   : > { %219 = vrot.lane.b32.xlu0 %v193_v28, %s542_s17  ;;  %201 = vrot.lane.b32.xlu1 %v193_v28, %s543_s25  ;;  %v191_v30 = vadd.f32 %v185_v26, %v176_v29  ;;  %v192_v33 = vadd.f32 %v187_v32, %v177_v31  ;;  %p482_p8 = por %p481_p7, %p480_p5 }
  0x43   : > { %p476_p4 = pneg %p475_p12 }
  0x45   : > { %p483_p9 = pnand %p482_p8, %p476_p4 }
  0x46   : > { %210 = vrot.lane.b32.xlu1 %v193_v28, %s544_s27  ;;  %197 = vrot.lane.b32.xlu0 %v191_v30, %s543_s25 }
  0x4a   : > { %206 = vrot.lane.b32.xlu1 %v191_v30, %s544_s27  ;;  %199 = vrot.lane.b32.xlu0 %v192_v33, %s543_s25 }
  0x4e   : > { %217 = vrot.lane.b32.xlu1 %v192_v33, %s542_s17  ;;  %208 = vrot.lane.b32.xlu0 %v192_v33, %s544_s27 }
  0x52   : > { %224 = vrot.lane.b32.xlu1 %v191_v30, %s545_s28  ;;  %215 = vrot.lane.b32.xlu0 %v191_v30, %s542_s17 }
  0x56   : > { %228 = vrot.lane.b32.xlu1 %v193_v28, %s545_s28  ;;  %226 = vrot.lane.b32.xlu0 %v192_v33, %s545_s28 }
  0xb4   : > { %v220_v34 = vpop.permute.xlu0 %219  ;;  %v202_v35 = vpop.permute.xlu1 %201 }
  0xb5   : > { %v236_v42 = vsel %vm233_vm5, %v202_v35, %v193_v28 }
  0xb8   : > { %v211_v36 = vpop.permute.xlu1 %210  ;;  %v198_v37 = vpop.permute.xlu0 %197 }
  0xb9   : > { %v240_v46 = vsel %vm237_vm6, %v236_v42, %v211_v36  ;;  %v234_v48 = vsel %vm233_vm5, %v198_v37, %v191_v30 }
  0xba   : > { %v244_v51 = vsel %vm241_vm7, %v240_v46, %v220_v34 }
  0xbc   : > { %v207_v38 = vpop.permute.xlu1 %206  ;;  %v200_v39 = vpop.permute.xlu0 %199 }
  0xbd   : > { %v235_v43 = vsel %vm233_vm5, %v200_v39, %v192_v33  ;;  %v238_v49 = vsel %vm237_vm6, %v234_v48, %v207_v38 }
  0xc0   : > { %v218_v40 = vpop.permute.xlu1 %217  ;;  %v209_v41 = vpop.permute.xlu0 %208 }
  0xc1   : > { %v239_v47 = vsel %vm237_vm6, %v235_v43, %v209_v41 }
  0xc2   : > { %v243_v53 = vsel %vm241_vm7, %v239_v47, %v218_v40 }
  0xc4   : > { %v225_v44 = vpop.permute.xlu1 %224  ;;  %v216_v45 = vpop.permute.xlu0 %215 }
  0xc5   : > { %v242_v50 = vsel %vm241_vm7, %v238_v49, %v216_v45 }
  0xc6   : > { %v246_v58 = vsel %vm245_vm8, %v242_v50, %v225_v44 }
  0xc7   : > { %v252_v60 = vmul.f32 0.4078072, %v246_v58  ;;  %v249_v61 = vmul.f32 0.2960964, %v246_v58 }
  0xc8   : > { %v229_v52 = vpop.permute.xlu1 %228  ;;  %v227_v54 = vpop.permute.xlu0 %226 }
  0xc9   : > { %v248_v55 = vsel %vm245_vm8, %v244_v51, %v229_v52  ;;  %v247_v56 = vsel %vm245_vm8, %v243_v53, %v227_v54 }
  0xca   : > { %v254_v57 = vmul.f32 0.4078072, %v248_v55  ;;  %v253_v59 = vmul.f32 0.4078072, %v247_v56  ;;  %v250_v62 = vmul.f32 0.2960964, %v247_v56 }
  0xcb   : > { %v251_v63 = vmul.f32 0.2960964, %v248_v55 }
  0xcc   : > { %262 = vrot.lane.b32.xlu0 %v254_v57, %s546_s29  ;;  %260 = vrot.lane.b32.xlu1 %v253_v59, %s546_s29 }
  0xd0   : > { %258 = vrot.lane.b32.xlu0 %v252_v60, %s546_s29  ;;  %273 = vrot.lane.b32.xlu1 %v249_v61, %s543_s25 }
  0xd4   : > { %275 = vrot.lane.b32.xlu0 %v250_v62, %s543_s25  ;;  %277 = vrot.lane.b32.xlu1 %v251_v63, %s543_s25 }
 0x13e   : > { %v263_v0 = vpop.permute.xlu0 %262  ;;  %v261_v1 = vpop.permute.xlu1 %260 }
 0x13f   : > { %v268_v5 = vadd.f32 %v261_v1, %v250_v62  ;;  %v269_v7 = vadd.f32 %v263_v0, %v251_v63 }
 0x142   : > { %v259_v2 = vpop.permute.xlu0 %258  ;;  %v274_v3 = vpop.permute.xlu1 %273 }
 0x143   : > { %v267_v4 = vadd.f32 %v259_v2, %v249_v61 }
 0x145   : > { %v282_v6 = vadd.f32 %v274_v3, %v267_v4 }
 0x146   : > { %v276_v8 = vpop.permute.xlu0 %275  ;;  %v278_v9 = vpop.permute.xlu1 %277 }
 0x147   : > { %285 = vst.msk [vmem:[%s134_s3] sm:$0xff] %vm241_vm7, %v282_v6  ;;  %v283_v10 = vadd.f32 %v276_v8, %v268_v5  ;;  %v284_v11 = vadd.f32 %v278_v9, %v269_v7 }
 0x149   : > { %286 = vst.msk [vmem:[%s134_s3 + $0x8] sm:$0xff] %vm241_vm7, %v283_v10 }
 0x14a   : > { %288 = vst.msk [vmem:[%s134_s3 + $0x10] sm:$0x3] %vm287_vm9, %v284_v11 }
 0x14b   : > { %486 = shalt.err (!%p483_p9)
}
 0x14c   : > { %s487_s24 = scalar_lea.hbm %s685_s14, 384  ;;  %s491_s17 = scalar_lea.hbm %s729_s1, 2304 }
 0x14d   : > { %p488_p13 = scmp.ne.s32.totalorder %s685_s14, %s487_s24  ;;  %p492_p2 = scmp.lt.s32.totalorder %s685_s14, %s729_s1 }
 0x14e   : > { %p493_p3 = scmp.lt.s32.totalorder %s491_s17, %s487_s24 }
 0x14f   : > { %p489_p1 = pnand %p488_p13, %p738_p11 }
 0x150   : > { %p494_p6 = por %p493_p3, %p492_p2 }
 0x151   : > { %p490_p0 = pneg %p489_p1 }
 0x153   : > { %p495_p10 = pnand %p494_p6, %p490_p0 }
 0x155   : > { %498 = shalt.err (!%p495_p10)
}
 0x156   : > { %s548_s28 = smov 128   ;;  %s549_s29 = smov 8  }
 0x157   : > { %392 = dma.vmem_to_hbm [thread:$0]  (%p738_p11), %s679_s4, 384, %s685_s14, %s290_s10, %s548_s28, %s548_s28, %s549_s29  }
 0x158 PF: > { %p403_p12 = scmp.ge.s32.totalorder %s537_s9, 2  ;;  %s318_s2 = sand.u32 1, %s525_s6  }
 0x159   : > { %p739_p4 = scmp.ne.s32.totalorder %s735_s19, 0  ;;  %s319_s3 = scalar_lea.sflag [#allocation4], %s318_s2 }
 0x15b   : > { %p399_p5 = pnand %p403_p12, %p739_p4 }
 0x15d   : > { %p400_p7 = pneg %p399_p5 }
 0x15f   : > { %520 = dma.done.wait (%p400_p7), %s319_s3, 384  }
 0x160   : > { %522 = vsyncadd (%p400_p7), %s319_s3, 4294966912  ;;  %p14_p8 = scmp.ge.s32.totalorder %s585_s12, 8   ;;  %s740_s6 = smov %s529_s7 }
 0x161   : > { %s741_s7 = smov %s533_s8  ;;  %s742_s8 = smov %s597_s15 }
 0x162   : > { %s743_s9 = smov %s585_s12  ;;  %16 = sbr.rel (!%p14_p8) target bundleno = 5 (0x5), region = 69 }
 0x167   :  { %324 = vsyncpa [#allocation3], 1 }
 0x168   :  { %326 = vsyncpa [#allocation3 + $0x1], 1 }
 0x169   :  { %327 = vsyncpa [#allocation4], 1 }
 0x16a   :  { %329 = vsyncpa [#allocation4 + $0x1], 1 }

</bundles_post_ra>
